<compile_context>
chip_gen: v7x
topology: tpu7x:2x2x1
jax: 0.10.0
libtpu: 0.0.40
codegen_flags: <defaults>
</compile_context>

<pallas_src>
import functools

import jax
import jax.numpy as jnp
from jax import lax
from jax.experimental import pallas as pl
from jax.experimental.pallas import tpu as pltpu

EPS = 1e-15
LANE = 128


def _round_up(x, m):
    return ((x + m - 1) // m) * m


def _vmem_capacity():
    try:
        return int(getattr(pltpu.get_tpu_info(), "vmem_capacity_bytes", 0) or 0)
    except Exception:
        return 0


def _vmem_limit():
    # v5e/v6e have 128 MiB VMEM/TC -> raise the scoped limit to 96 MiB.
    # v7x has 64 MiB/TC (unknown chips default here too) -> 48 MiB.
    return (96 << 20) if _vmem_capacity() >= (96 << 20) else (48 << 20)


def _pick_tiles(n):
    """Per-chip tile selection.

    v5e/v6e (128 MiB VMEM):  tm<=1024, tk<=4096 (amortize step overhead, fewer XW passes)
    v7x     (64 MiB VMEM, ~3.2 TB/s): tm<=1024, tk<=2048 -- big blocks keep the
            aggregation BW-bound instead of grid-step-overhead bound.
    Everything padded to multiples of 256: lane-dense blocks, full 256-wide MXU,
    int8 (32,128) packing satisfied, and tm is split so >=2 dest-row tiles exist
    whenever possible (v7x has 2 TensorCores).
    """
    if _vmem_capacity() >= (96 << 20):
        tm_t, tk_t = 1024, 4096
    else:
        tm_t, tk_t = 1024, 2048

    n0 = _round_up(max(n, 256), 256)

    # Dest-row tile: power-of-two multiple of 256, >=2 row tiles when possible,
    # and <=12.5% row padding.
    tm = 256
    for cand in (512, 1024):
        if cand <= tm_t and 2 * cand <= n0 and _round_up(n0, cand) * 8 <= n0 * 9:
            tm = cand
    n_pad = _round_up(n0, tm)

    # Reduction (source) tile: a multiple of tm, <= tk_t, dividing n_pad.
    nk = -(-n_pad // tk_t)                       # cdiv
    tk = _round_up(-(-n_pad // nk), tm)          # tk_t is a multiple of tm -> tk <= tk_t
    n_pad = tk * nk
    return n_pad, tm, tk


def _pad2(a, rows, cols, dtype):
    return jnp.pad(a, ((0, rows - a.shape[0]), (0, cols - a.shape[1]))).astype(dtype)


def _pad_layer(w, b):
    ci, co = w.shape
    ci_p, co_p = _round_up(ci, LANE), _round_up(co, LANE)
    return _pad2(w, ci_p, co_p, jnp.bfloat16), _pad2(b, 1, co_p, jnp.float32)


def _xw_resident_ok(n, c_out):
    # Double-buffered full XW must fit comfortably in the scoped VMEM budget.
    return 2 * n * c_out * 2 <= _vmem_limit() // 2


# ---------------------------------------------------------------------------
# Kernel 1: per-layer feature transform  XW = X @ W  (bf16 MXU, f32 acc)
# ---------------------------------------------------------------------------
def _xw_kernel(x_ref, w_ref, o_ref):
    o_ref[...] = jnp.dot(
        x_ref[...], w_ref[...], preferred_element_type=jnp.float32
    ).astype(o_ref.dtype)


def feature_transform(x_bf16, w_bf16, *, tm):
    n, c_in = x_bf16.shape
    c_out = w_bf16.shape[1]
    return pl.pallas_call(
        _xw_kernel,
        out_shape=jax.ShapeDtypeStruct((n, c_out), jnp.bfloat16),
        grid_spec=pltpu.PrefetchScalarGridSpec(
            num_scalar_prefetch=0,
            grid=(n // tm,),
            in_specs=[
                pl.BlockSpec((tm, c_in), lambda i: (i, 0)),
                pl.BlockSpec((c_in, c_out), lambda i: (0, 0)),
            ],
            out_specs=pl.BlockSpec((tm, c_out), lambda i: (i, 0)),
        ),
        compiler_params=pltpu.CompilerParams(
            dimension_semantics=("parallel",),
            vmem_limit_bytes=_vmem_limit(),
        ),
        cost_estimate=pl.CostEstimate(
            flops=2 * n * c_in * c_out,
            transcendentals=0,
            bytes_accessed=2 * (n * c_in + c_in * c_out + n * c_out),
        ),
    )(x_bf16, w_bf16)


# ---------------------------------------------------------------------------
# Kernel 2: tiled aggregation  h = relu(A^T @ XW + b)   (non-last GCN layers)
#   grid = (dest row tiles [parallel], source reduction tiles [arbitrary, last]).
#   The transpose of A is folded into the index_map: for output block (i, .)
#   we load adjacency block (k, i) and contract its *source* axis (no adj.T in HBM).
#   Adjacency arrives as int8 (0/1) and is upcast to bf16 just before the MXU dot.
# ---------------------------------------------------------------------------
def _agg_kernel(adj_ref, xw_ref, b_ref, o_ref, *maybe_acc, nk, tk, xw_resident):
    k = pl.program_id(1)
    adj = adj_ref[...].astype(jnp.bfloat16)                 # int8 0/1 -> bf16 (exact)
    if xw_resident and nk > 1:
        start = pl.multiple_of(k * tk, tk)
        xw = xw_ref[pl.ds(start, tk), :]                    # resident XW, slice per k
    else:
        xw = xw_ref[...]
    # adj block is (source, dest): contracting the source axis of both operands
    # gives (A^T @ XW) for this tile.
    # TODO(synk): verify via pl.lower_as_mlir that this dim-0 contraction lowers
    # without a per-step XLU relayout on all chip generations.
    part = lax.dot_general(adj, xw, (((0,), (0,)), ((), ())),
                           preferred_element_type=jnp.float32)

    if nk == 1:
        o_ref[...] = jnp.maximum(part + b_ref[...], 0.0).astype(o_ref.dtype)
    else:
        acc_ref = maybe_acc[0]

        @pl.when(k == 0)
        def _init():
            acc_ref[...] = jnp.zeros_like(acc_ref)

        acc_ref[...] += part

        @pl.when(k == nk - 1)
        def _finalize():
            o_ref[...] = jnp.maximum(acc_ref[...] + b_ref[...], 0.0).astype(o_ref.dtype)


def gcn_aggregate_relu(adj_i8, xw_bf16, b_f32, *, tm, tk):
    n = adj_i8.shape[0]
    c_out = xw_bf16.shape[1]
    nk = n // tk
    xw_resident = _xw_resident_ok(n, c_out)
    xw_spec = (pl.BlockSpec((n, c_out), lambda i, k: (0, 0)) if xw_resident
               else pl.BlockSpec((tk, c_out), lambda i, k: (k, 0)))
    scratch = [] if nk == 1 else [pltpu.VMEM((tm, c_out), jnp.float32)]
    kern = functools.partial(_agg_kernel, nk=nk, tk=tk, xw_resident=xw_resident)
    return pl.pallas_call(
        kern,
        out_shape=jax.ShapeDtypeStruct((n, c_out), jnp.bfloat16),
        grid_spec=pltpu.PrefetchScalarGridSpec(
            num_scalar_prefetch=0,
            grid=(n // tm, nk),
            in_specs=[
                pl.BlockSpec((tk, tm), lambda i, k: (k, i)),      # adj[src, dst], int8
                xw_spec,                                          # XW (resident or tiled)
                pl.BlockSpec((1, c_out), lambda i, k: (0, 0)),    # bias
            ],
            out_specs=pl.BlockSpec((tm, c_out), lambda i, k: (i, 0)),
            scratch_shapes=scratch,
        ),
        compiler_params=pltpu.CompilerParams(
            dimension_semantics=("parallel", "arbitrary"),
            vmem_limit_bytes=_vmem_limit(),
        ),
        cost_estimate=pl.CostEstimate(
            flops=2 * n * n * c_out,
            transcendentals=0,
            bytes_accessed=n * n + 4 * n * c_out,
        ),
    )(adj_i8, xw_bf16, b_f32)


# ---------------------------------------------------------------------------
# Kernel 3: LAST GCN layer aggregation fused with the MLP (Identity act),
#   softmax, and the just_balance partial sum-of-squares.  At k == last the
#   (tm, c_out) f32 tile is resident in VMEM, so h never round-trips HBM.
#   Per-row-tile partial rows of diag(p^T p) are emitted and reduced in the
#   wrapper, keeping the row axis fully parallel (v7x 2 TCs).
# ---------------------------------------------------------------------------
def _agg_tail_kernel(adj_ref, xw_ref, b_ref, *rest,
                     nk, tk, tm, num_mlp, n_true, k_true, xw_resident):
    wb = rest[:2 * num_mlp]
    if nk > 1:
        p_ref, ss_ref, acc_ref = rest[2 * num_mlp:]
    else:
        p_ref, ss_ref = rest[2 * num_mlp:]
        acc_ref = None
    i = pl.program_id(0)
    k = pl.program_id(1)

    adj = adj_ref[...].astype(jnp.bfloat16)                 # int8 0/1 -> bf16 (exact)
    if xw_resident and nk > 1:
        start = pl.multiple_of(k * tk, tk)
        xw = xw_ref[pl.ds(start, tk), :]
    else:
        xw = xw_ref[...]
    part = lax.dot_general(adj, xw, (((0,), (0,)), ((), ())),
                           preferred_element_type=jnp.float32)

    def tail(acc_f32):
        # h = relu(A^T XW + b); keep f32, cast to bf16 only at the MXU input.
        h = jnp.maximum(acc_f32 + b_ref[...], 0.0)
        z = h
        for l in range(num_mlp):                            # mlp_act = Identity
            w = wb[2 * l][...]
            bb = wb[2 * l + 1][...]
            z = jnp.dot(z.astype(jnp.bfloat16), w,
                        preferred_element_type=jnp.float32) + bb
        # Softmax over the real cluster lanes only (padded lanes -> probability 0).
        col = lax.broadcasted_iota(jnp.int32, z.shape, 1)
        logits = jnp.where(col < k_true, z, -jnp.inf)
        m = jnp.max(logits, axis=-1, keepdims=True)
        e = jnp.exp(logits - m)
        p = e / jnp.sum(e, axis=-1, keepdims=True)
        p_ref[...] = p
        # Partial diag(p^T p)[j] for this row tile -- padded node rows masked out.
        row = i * tm + lax.broadcasted_iota(jnp.int32, p.shape, 0)
        pv = jnp.where(row < n_true, p, 0.0)
        ss_ref[...] = jnp.sum(pv * pv, axis=0, keepdims=True)[None]

    if nk == 1:
        tail(part)
    else:
        @pl.when(k == 0)
        def _init():
            acc_ref[...] = jnp.zeros_like(acc_ref)

        acc_ref[...] += part

        @pl.when(k == nk - 1)
        def _finalize():
            tail(acc_ref[...])


def gcn_aggregate_mlp_balance(adj_i8, xw_bf16, b_f32, mlp_params, *, tm, tk,
                              n_true, k_true):
    n = adj_i8.shape[0]
    c_out = xw_bf16.shape[1]
    k_pad = mlp_params[-1][0].shape[1]
    nk = n // tk
    ni = n // tm
    num_mlp = len(mlp_params)

    xw_resident = _xw_resident_ok(n, c_out)
    xw_spec = (pl.BlockSpec((n, c_out), lambda i, k: (0, 0)) if xw_resident
               else pl.BlockSpec((tk, c_out), lambda i, k: (k, 0)))

    flat, wb_specs = [], []
    for w, b in mlp_params:
        flat += [w, b]
        wb_specs.append(pl.BlockSpec(w.shape, lambda i, k: (0, 0)))
        wb_specs.append(pl.BlockSpec(b.shape, lambda i, k: (0, 0)))

    scratch = [] if nk == 1 else [pltpu.VMEM((tm, c_out), jnp.float32)]
    kern = functools.partial(_agg_tail_kernel, nk=nk, tk=tk, tm=tm,
                             num_mlp=num_mlp, n_true=n_true, k_true=k_true,
                             xw_resident=xw_resident)

    p_pad, ss_part = pl.pallas_call(
        kern,
        out_shape=(
            jax.ShapeDtypeStruct((n, k_pad), jnp.float32),
            jax.ShapeDtypeStruct((ni, 1, k_pad), jnp.float32),
        ),
        grid_spec=pltpu.PrefetchScalarGridSpec(
            num_scalar_prefetch=0,
            grid=(ni, nk),
            in_specs=[
                pl.BlockSpec((tk, tm), lambda i, k: (k, i)),      # adj[src, dst], int8
                xw_spec,
                pl.BlockSpec((1, c_out), lambda i, k: (0, 0)),    # GCN bias
            ] + wb_specs,                                         # MLP weights/biases
            out_specs=(
                pl.BlockSpec((tm, k_pad), lambda i, k: (i, 0)),
                pl.BlockSpec((1, 1, k_pad), lambda i, k: (i, 0, 0)),
            ),
            scratch_shapes=scratch,
        ),
        compiler_params=pltpu.CompilerParams(
            dimension_semantics=("parallel", "arbitrary"),
            vmem_limit_bytes=_vmem_limit(),
        ),
        cost_estimate=pl.CostEstimate(
            flops=2 * n * n * c_out,
            transcendentals=n * k_pad,
            bytes_accessed=n * n + 2 * n * c_out + 4 * n * k_pad,
        ),
    )(adj_i8, xw_bf16, b_f32, *flat)

    # Tiny wrapper-side reduction of the per-tile partial rows + final loss.
    sumsq = jnp.sum(ss_part, axis=0)[0, :k_true]             # (k_true,)
    loss = -jnp.sum(jnp.sqrt(sumsq + EPS)) / jnp.sqrt(jnp.float32(n_true * k_true))
    return p_pad, loss


# ---------------------------------------------------------------------------
# Full JustBalance forward
# ---------------------------------------------------------------------------
def just_balance_forward(x, adj, params):
    n_true, c_in = x.shape
    k_true = params["mlp"][-1][0].shape[1]      # n_clusters
    n_pad, tm, tk = _pick_tiles(n_true)
    c_in_pad = _round_up(c_in, LANE)

    # Zero padding is exact for this model; adjacency is 0/1 -> exact in int8.
    x_p = _pad2(x, n_pad, c_in_pad, jnp.bfloat16)
    adj_p = _pad2(adj, n_pad, n_pad, jnp.int8)
    mp_p = [_pad_layer(w, b) for w, b in params["mp"]]
    mlp_p = [_pad_layer(w, b) for w, b in params["mlp"]]

    assert len(mp_p) >= 1
    h = x_p
    for w, b in mp_p[:-1]:                      # GCNConv(normalize=False) + ReLU
        xw = feature_transform(h, w, tm=tm)     # XW computed once per layer
        h = gcn_aggregate_relu(adj_p, xw, b, tm=tm, tk=tk)

    # Last GCN layer fused with the MLP / softmax / balance-loss tail.
    w_last, b_last = mp_p[-1]
    xw = feature_transform(h, w_last, tm=tm)
    p_pad, loss = gcn_aggregate_mlp_balance(
        adj_p, xw, b_last, mlp_p, tm=tm, tk=tk, n_true=n_true, k_true=k_true)
    return p_pad[:n_true, :k_true], loss


# ---------------------------------------------------------------------------
# Pure-JAX references (correctness check)
# ---------------------------------------------------------------------------
def reference_forward(x, adj, params, mxu_dtype=None):
    """mxu_dtype=jnp.bfloat16 emulates the kernel's MXU operand precision
    (f32 accumulation); None gives a full-f32 reference."""
    def mm(a, b):
        if mxu_dtype is not None:
            return jnp.dot(a.astype(mxu_dtype), b.astype(mxu_dtype),
                           preferred_element_type=jnp.float32)
        return jnp.dot(a, b, precision=lax.Precision.HIGHEST,
                       preferred_element_type=jnp.float32)

    adj_t = adj.T
    h = x
    for w, b in params["mp"]:
        h = jnp.maximum(mm(adj_t, mm(h, w)) + b, 0.0)
    s = h
    for w, b in params["mlp"]:
        s = mm(s, w) + b
    p = jax.nn.softmax(s, axis=-1)
    n, k = s.shape
    ss = jnp.dot(p.T, p, precision=lax.Precision.HIGHEST,
                 preferred_element_type=jnp.float32)
    loss = -jnp.trace(jnp.sqrt(ss + EPS)) / jnp.sqrt(jnp.float32(n * k))
    return p, loss


def init_params(key, in_channels, mp_units, mlp_units, n_clusters):
    params = {"mp": [], "mlp": []}
    dims = [in_channels] + list(mp_units)
    for i in range(len(mp_units)):
        key, kw, kb = jax.random.split(key, 3)
        fan_in, fan_out = dims[i], dims[i + 1]
        w = jax.random.normal(kw, (fan_in, fan_out), jnp.float32) / jnp.sqrt(fan_in)
        b = jax.random.normal(kb, (1, fan_out), jnp.float32) * 0.01
        params["mp"].append((w, b))
    mlp_dims = [mp_units[-1]] + list(mlp_units) + [n_clusters]
    for i in range(len(mlp_dims) - 1):
        key, kw, kb = jax.random.split(key, 3)
        fan_in, fan_out = mlp_dims[i], mlp_dims[i + 1]
        w = jax.random.normal(kw, (fan_in, fan_out), jnp.float32) / jnp.sqrt(fan_in)
        b = jax.random.normal(kb, (1, fan_out), jnp.float32) * 0.01
        params["mlp"].append((w, b))
    return params


if __name__ == "__main__":
    # Small synthetic instance: N=16 nodes, in_channels=8, mp_units=[32,32] (ReLU),
    # mlp_units=[16] (Identity), n_clusters=4.
    N, in_channels = 16, 8
    mp_units, mlp_units, n_clusters = [32, 32], [16], 4

    key = jax.random.PRNGKey(0)
    key, kx = jax.random.split(key)
    x = jax.random.normal(kx, (N, in_channels), jnp.float32)

    # Undirected ring graph -> dense adjacency (to_dense_adj equivalent, batch 1).
    src = jnp.arange(N)
    dst = (src + 1) % N
    adj = jnp.zeros((N, N), jnp.float32)
    adj = adj.at[src, dst].set(1.0)
    adj = adj.at[dst, src].set(1.0)

    params = init_params(key, in_channels, mp_units, mlp_units, n_clusters)

    p, loss = just_balance_forward(x, adj, params)
    jax.block_until_ready((p, loss))

    # bf16-MXU-matched reference (tight) and full-f32 reference (loose).
    p_bf, loss_bf = reference_forward(x, adj, params, mxu_dtype=jnp.bfloat16)
    p_fp, loss_fp = reference_forward(x, adj, params)

    assert p.shape == (N, n_clusters)
    assert bool(jnp.all(jnp.isfinite(p)))
    assert jnp.allclose(p, p_bf, atol=2e-3, rtol=2e-3), "softmax(s) mismatch"
    assert jnp.allclose(loss, loss_bf, atol=2e-3, rtol=2e-3), "balance loss mismatch"
    assert jnp.allclose(p, p_fp, atol=5e-2, rtol=5e-2), "softmax(s) drift vs f32 ref"
    assert jnp.allclose(loss, loss_fp, atol=2e-2, rtol=2e-2), "loss drift vs f32 ref"

    print("KERNEL_OK")
</pallas_src>

<mosaic_0001>
module attributes {stable_mosaic.version = 11 : i64} {
  func.func @_xw_kernel(%arg0: i32, %arg1: memref<256x128xbf16, #tpu.memory_space<vmem>>, %arg2: memref<128x128xbf16, #tpu.memory_space<vmem>>, %arg3: memref<256x128xbf16, #tpu.memory_space<vmem>>) attributes {dimension_semantics = [#tpu.dimension_semantics<parallel>], iteration_bounds = array<i64: 1>, scalar_prefetch = 0 : i64, scratch_operands = 0 : i64, tpu.core_type = #tpu.core_type<tc>, window_params = [{transform_indices = @transform_0, window_bounds = array<i64: 256, 128>}, {pipeline_mode = #tpu.pipeline_mode<synchronous>, transform_indices = @transform_1, window_bounds = array<i64: 128, 128>}, {transform_indices = @transform_2, window_bounds = array<i64: 256, 128>}]} {
    %c0 = arith.constant 0 : index
    %c0_0 = arith.constant 0 : index
    %0 = vector.load %arg1[%c0, %c0_0] : memref<256x128xbf16, #tpu.memory_space<vmem>>, vector<256x128xbf16>
    %c0_1 = arith.constant 0 : index
    %c0_2 = arith.constant 0 : index
    %1 = vector.load %arg2[%c0_1, %c0_2] : memref<128x128xbf16, #tpu.memory_space<vmem>>, vector<128x128xbf16>
    %cst = arith.constant dense<0.000000e+00> : vector<256x128xf32>
    %2 = tpu.matmul %0, %1, %cst {dimension_numbers = #tpu.dot_dimension_numbers<[1], [0], [0], [1], [0, 0, 1, 1], [], []>} : vector<256x128xbf16>, vector<128x128xbf16>, vector<256x128xf32> -> vector<256x128xf32>
    %3 = arith.truncf %2 : vector<256x128xf32> to vector<256x128xbf16>
    %c0_3 = arith.constant 0 : index
    %c0_4 = arith.constant 0 : index
    %4 = vector.load %arg3[%c0_3, %c0_4] : memref<256x128xbf16, #tpu.memory_space<vmem>>, vector<256x128xbf16>
    tpu.vector_store %arg3[%c0_3, %c0_4], %3 {strides = array<i32>} : memref<256x128xbf16, #tpu.memory_space<vmem>>, vector<256x128xbf16>,
    return
  }
  func.func @transform_0(%arg0: i32) -> (i32, i32) {
    %c0_i32 = arith.constant 0 : i32
    %c0_i32_0 = arith.constant 0 : i32
    return %arg0, %c0_i32 : i32, i32
  }
  func.func @transform_1(%arg0: i32) -> (i32, i32) {
    %c0_i32 = arith.constant 0 : i32
    %c0_i32_0 = arith.constant 0 : i32
    %c0_i32_1 = arith.constant 0 : i32
    return %c0_i32, %c0_i32_0 : i32, i32
  }
  func.func @transform_2(%arg0: i32) -> (i32, i32) {
    %c0_i32 = arith.constant 0 : i32
    %c0_i32_0 = arith.constant 0 : i32
    return %arg0, %c0_i32 : i32, i32
  }
}

</mosaic_0001>

<bundles_post_ra>
// kernel: tpu_custom_call.1
= control target key start
LH: loop header
LB: loop body
LE: loop exit
PB: predicated region body
PF: predicated region fallthrough
CT: control target
= control target key end

     0   :  { %7 = vsyncpa [#allocation3], 0  ;;  %s1009_s0 = inlined_call_operand.hbm [shape: bf16[256,128], index: 0, kind: input, shape index: {}]   ;;  %s1010_s1 = inlined_call_operand.hbm [shape: bf16[128,128], index: 1, kind: input, shape index: {}]   ;;  %s1011_s2 = inlined_call_operand.hbm [shape: bf16[256,128], index: 2, kind: output, shape index: {}]  }
   0x1   :  { %8 = vsyncpa [#allocation6], 0 }
   0x2   :  { %9 = vsyncpa [#allocation4], 0  ;;  %s944_s9 = smov [#allocation2]   ;;  %s872_s13 = scalar_lea.hbm %s1009_s0, 2048 }
   0x3   :  { %s15_s10 = sshll.u32 %s944_s9, 4  ;;  %p873_p0 = scmp.ne.s32.totalorder %s1009_s0, %s872_s13  ;;  %s16_s10 = int_to_ptr.vmem [resolvable:$true] %s15_s10 }
   0x4   :  { %p876_p1 = scmp.lt.u32.totalorder %s872_s13, %s1009_s0 }
   0x6   :  { %p878_p2 = pnand %p876_p1, %p873_p0 }
   0x8   :  { %881 = shalt.err (!%p878_p2)
}
   0x9   :  { %s882_s18 = scalar_lea.vmem %s16_s10, 2048  ;;  %p887_p4 = scmp.lt.s32.totalorder %s16_s10, %s16_s10 }
   0xa   :  { %p883_p3 = scmp.ne.s32.totalorder %s16_s10, %s882_s18  ;;  %p888_p5 = scmp.lt.s32.totalorder %s882_s18, %s882_s18 }
   0xc   :  { %p889_p6 = por %p888_p5, %p887_p4 }
   0xe   :  { %p890_p7 = pnand %p889_p6, %p883_p3 }
  0x10   :  { %893 = shalt.err (!%p890_p7)
}
  0x11   :  { %s945_s19 = smov 64   ;;  %s946_s20 = smov 4  }
  0x12   :  { %21 = dma.hbm_to_vmem [thread:$0]  %s1009_s0, 2048, %s16_s10, [#allocation3], %s945_s19, %s945_s19, %s946_s20  }
  0x13   :  { %s947_s23 = smov [#allocation5]   ;;  %s894_s27 = scalar_lea.hbm %s1010_s1, 1024 }
  0x14   :  { %s27_s24 = sshll.u32 %s947_s23, 4  ;;  %p895_p8 = scmp.ne.s32.totalorder %s1010_s1, %s894_s27  ;;  %s28_s24 = int_to_ptr.vmem [resolvable:$true] %s27_s24 }
  0x15   :  { %p898_p9 = scmp.lt.u32.totalorder %s894_s27, %s1010_s1 }
  0x17   :  { %p900_p10 = pnand %p898_p9, %p895_p8 }
  0x19   :  { %903 = shalt.err (!%p900_p10)
}
  0x1a   :  { %s904_s4 = scalar_lea.vmem %s28_s24, 1024  ;;  %p909_p12 = scmp.lt.s32.totalorder %s28_s24, %s28_s24 }
  0x1b   :  { %p905_p11 = scmp.ne.s32.totalorder %s28_s24, %s904_s4  ;;  %p910_p13 = scmp.lt.s32.totalorder %s904_s4, %s904_s4 }
  0x1d   :  { %p911_p0 = por %p910_p13, %p909_p12 }
  0x1f   :  { %p912_p1 = pnand %p911_p0, %p905_p11 }
  0x21   :  { %915 = shalt.err (!%p912_p1)
}
  0x22   :  { %33 = dma.hbm_to_vmem [thread:$0]  %s1010_s1, 1024, %s28_s24, [#allocation6], %s945_s19, %s945_s19, %s946_s20  }
  0x23   :  { %938 = dma.done.wait [#allocation3], 2048  }
  0x24   :  { %939 = vsyncadd [#allocation3], 4294965248 }
  0x25   :  { %940 = dma.done.wait [#allocation6], 1024  }
  0x26   :  { %941 = vsyncadd [#allocation6], 4294966272  ;;  %v848_v0 = vld [vmem:[#allocation5] sm:$0xff]   ;;  %v849_v1 = vld [vmem:[#allocation5 + $0x8] sm:$0xff]   ;;  %s948_s1 = smov [#allocation7]  }
  0x27   :  { %779 = vmatprep.subr.bf16.mxu0 %v848_v0  ;;  %827 = vmatprep.subr.bf16.mxu1 %v848_v0  ;;  %v850_v2 = vld [vmem:[#allocation5 + $0x10] sm:$0xff]   ;;  %v851_v3 = vld [vmem:[#allocation5 + $0x18] sm:$0xff]   ;;  %v856_v4 = vld [vmem:[#allocation2] sm:$0xff]   ;;  %s559_s6 = sshll.u32 %s948_s1, 4  ;;  %s560_s6 = int_to_ptr.vmem [resolvable:$true] %s559_s6 }
  0x28   :  { %780 = vmatpush3.bf16.msra.mxu0 %v848_v0  ;;  %835 = vmatpush3.bf16.msra.mxu1 %v848_v0  ;;  %v857_v5 = vld [vmem:[#allocation2 + $0x40] sm:$0xff]   ;;  %v853_v7 = vld [vmem:[#allocation5 + $0x28] sm:$0xff]   ;;  %v854_v8 = vld [vmem:[#allocation5 + $0x30] sm:$0xff]   ;;  %s916_s7 = scalar_lea.vmem %s560_s6, 2048  ;;  %p921_p3 = scmp.lt.s32.totalorder %s560_s6, %s560_s6 }
  0x29   :  { %781 = vmatprep.subr.bf16.mxu0 %v849_v1  ;;  %828 = vmatprep.subr.bf16.mxu1 %v849_v1  ;;  %v852_v6 = vld [vmem:[#allocation5 + $0x20] sm:$0xff]   ;;  %v855_v9 = vld [vmem:[#allocation5 + $0x38] sm:$0xff]   ;;  %v858_v10 = vld [vmem:[#allocation2 + $0x8] sm:$0xff]   ;;  %p917_p2 = scmp.ne.s32.totalorder %s560_s6, %s916_s7  ;;  %p922_p4 = scmp.lt.s32.totalorder %s916_s7, %s916_s7 }
  0x2a   :  { %795 = vmatprep.mubr.bf16.mxu0 %v856_v4  ;;  %811 = vmatprep.mubr.bf16.mxu1 %v857_v5  ;;  %v859_v11 = vld [vmem:[#allocation2 + $0x48] sm:$0xff]   ;;  %v860_v12 = vld [vmem:[#allocation2 + $0x10] sm:$0xff]   ;;  %v862_v14 = vld [vmem:[#allocation2 + $0x18] sm:$0xff]  }
  0x2b   :  { %v861_v13 = vld [vmem:[#allocation2 + $0x50] sm:$0xff]   ;;  %v863_v15 = vld [vmem:[#allocation2 + $0x58] sm:$0xff]   ;;  %v864_v16 = vld [vmem:[#allocation2 + $0x20] sm:$0xff]   ;;  %p923_p5 = por %p922_p4, %p921_p3 }
  0x2c   :  { %782 = vmatpush3.bf16.msra.mxu0 %v849_v1  ;;  %836 = vmatpush3.bf16.msra.mxu1 %v849_v1  ;;  %v865_v17 = vld [vmem:[#allocation2 + $0x60] sm:$0xff]   ;;  %v866_v18 = vld [vmem:[#allocation2 + $0x28] sm:$0xff]   ;;  %v868_v20 = vld [vmem:[#allocation2 + $0x30] sm:$0xff]  }
  0x2d   :  { %783 = vmatprep.subr.bf16.mxu0 %v850_v2  ;;  %829 = vmatprep.subr.bf16.mxu1 %v850_v2  ;;  %v867_v19 = vld [vmem:[#allocation2 + $0x68] sm:$0xff]   ;;  %v869_v21 = vld [vmem:[#allocation2 + $0x70] sm:$0xff]   ;;  %v870_v22 = vld [vmem:[#allocation2 + $0x38] sm:$0xff]   ;;  %p924_p6 = pnand %p923_p5, %p917_p2 }
  0x2e   :  { %v871_v23 = vld [vmem:[#allocation2 + $0x78] sm:$0xff]  }
  0x30   :  { %784 = vmatpush3.bf16.msra.mxu0 %v850_v2  ;;  %837 = vmatpush3.bf16.msra.mxu1 %v850_v2 }
  0x31   :  { %785 = vmatprep.subr.bf16.mxu0 %v851_v3  ;;  %830 = vmatprep.subr.bf16.mxu1 %v851_v3 }
  0x34   :  { %786 = vmatpush3.bf16.msra.mxu0 %v851_v3  ;;  %838 = vmatpush3.bf16.msra.mxu1 %v851_v3 }
  0x35   :  { %787 = vmatprep.subr.bf16.mxu0 %v852_v6  ;;  %831 = vmatprep.subr.bf16.mxu1 %v852_v6 }
  0x38   :  { %788 = vmatpush3.bf16.msra.mxu0 %v852_v6  ;;  %839 = vmatpush3.bf16.msra.mxu1 %v852_v6 }
  0x39   :  { %789 = vmatprep.subr.bf16.mxu0 %v853_v7  ;;  %832 = vmatprep.subr.bf16.mxu1 %v853_v7 }
  0x3c   :  { %790 = vmatpush3.bf16.msra.mxu0 %v853_v7  ;;  %840 = vmatpush3.bf16.msra.mxu1 %v853_v7 }
  0x3d   :  { %791 = vmatprep.subr.bf16.mxu0 %v854_v8  ;;  %833 = vmatprep.subr.bf16.mxu1 %v854_v8 }
  0x40   :  { %792 = vmatpush3.bf16.msra.mxu0 %v854_v8  ;;  %841 = vmatpush3.bf16.msra.mxu1 %v854_v8 }
  0x41   :  { %793 = vmatprep.subr.bf16.mxu0 %v855_v9  ;;  %834 = vmatprep.subr.bf16.mxu1 %v855_v9 }
  0x44   :  { %794 = vmatpush3.bf16.msra.mxu0 %v855_v9  ;;  %842 = vmatpush3.bf16.msra.mxu1 %v855_v9 }
  0x47   :  { %796 = vmatmul.mubr.bf16.vlgmr.msra.gmra.mrb[0].mxu0 %v858_v10  ;;  %812 = vmatmul.mubr.bf16.vlgmr.msra.gmra.mrb[0].mxu1 %v859_v11 }
  0x48   :  { %799 = vmatprep.mubr.bf16.mxu0 %v860_v12  ;;  %815 = vmatprep.mubr.bf16.mxu1 %v861_v13 }
  0x4f   :  { %800 = vmatmul.mubr.bf16.gmra.mrb[4].mxu0 %v862_v14  ;;  %816 = vmatmul.mubr.bf16.gmra.mrb[4].mxu1 %v863_v15 }
  0x50   :  { %803 = vmatprep.mubr.bf16.mxu0 %v864_v16  ;;  %819 = vmatprep.mubr.bf16.mxu1 %v865_v17 }
  0x57   :  { %804 = vmatmul.mubr.bf16.gmra.mrb[8].mxu0 %v866_v18  ;;  %820 = vmatmul.mubr.bf16.gmra.mrb[8].mxu1 %v867_v19 }
  0x58   :  { %807 = vmatprep.mubr.bf16.mxu0 %v868_v20  ;;  %823 = vmatprep.mubr.bf16.mxu1 %v869_v21 }
  0x5f   :  { %808 = vmatmul.mubr.bf16.gmra.mrb[12].mxu0 %v870_v22  ;;  %824 = vmatmul.mubr.bf16.gmra.mrb[12].mxu1 %v871_v23 }
 0x11a   :  { %v797_v24 = vpop.f32.mrb[0].mxu0  ;;  %v813_v25 = vpop.f32.mrb[0].mxu1 }
 0x11b   :  { %v267_v26 = vpop.f32.mrb[1].mxu0  ;;  %v331_v27 = vpop.f32.mrb[1].mxu1 }
 0x11c   :  { %v798_v28 = vpop.f32.mrb[2].mxu0  ;;  %v814_v29 = vpop.f32.mrb[2].mxu1 }
 0x11d   :  { %v668_v30 = vpack.c.bf16 %v798_v28, %v797_v24  ;;  %v708_v31 = vpack.c.bf16 %v814_v29, %v813_v25  ;;  %v270_v32 = vpop.f32.mrb[3].mxu0  ;;  %v334_v33 = vpop.f32.mrb[3].mxu1 }
 0x11e   :  { %v663_v34 = vpack.c.bf16 %v270_v32, %v267_v26  ;;  %v703_v35 = vpack.c.bf16 %v334_v33, %v331_v27 }
 0x11f   :  { %740 = vst [vmem:[#allocation7 + $0x8] sm:$0xff] %v668_v30   ;;  %748 = vst [vmem:[#allocation7 + $0x48] sm:$0xff] %v708_v31  }
 0x120   :  { %664 = vst [vmem:[#allocation7] sm:$0xff] %v663_v34   ;;  %747 = vst [vmem:[#allocation7 + $0x40] sm:$0xff] %v703_v35  }
 0x122   :  { %v801_v36 = vpop.f32.mrb[4].mxu0  ;;  %v817_v37 = vpop.f32.mrb[4].mxu1 }
 0x123   :  { %v283_v38 = vpop.f32.mrb[5].mxu0  ;;  %v347_v39 = vpop.f32.mrb[5].mxu1 }
 0x124   :  { %v802_v40 = vpop.f32.mrb[6].mxu0  ;;  %v818_v41 = vpop.f32.mrb[6].mxu1 }
 0x125   :  { %v678_v42 = vpack.c.bf16 %v802_v40, %v801_v36  ;;  %v718_v43 = vpack.c.bf16 %v818_v41, %v817_v37  ;;  %v286_v44 = vpop.f32.mrb[7].mxu0  ;;  %v350_v45 = vpop.f32.mrb[7].mxu1 }
 0x126   :  { %v673_v46 = vpack.c.bf16 %v286_v44, %v283_v38  ;;  %v713_v47 = vpack.c.bf16 %v350_v45, %v347_v39 }
 0x127   :  { %742 = vst [vmem:[#allocation7 + $0x18] sm:$0xff] %v678_v42   ;;  %750 = vst [vmem:[#allocation7 + $0x58] sm:$0xff] %v718_v43  }
 0x128   :  { %741 = vst [vmem:[#allocation7 + $0x10] sm:$0xff] %v673_v46   ;;  %749 = vst [vmem:[#allocation7 + $0x50] sm:$0xff] %v713_v47  }
 0x12a   :  { %v805_v48 = vpop.f32.mrb[8].mxu0  ;;  %v821_v49 = vpop.f32.mrb[8].mxu1 }
 0x12b   :  { %v299_v50 = vpop.f32.mrb[9].mxu0  ;;  %v363_v51 = vpop.f32.mrb[9].mxu1 }
 0x12c   :  { %v806_v52 = vpop.f32.mrb[10].mxu0  ;;  %v822_v53 = vpop.f32.mrb[10].mxu1 }
 0x12d   :  { %v688_v54 = vpack.c.bf16 %v806_v52, %v805_v48  ;;  %v728_v55 = vpack.c.bf16 %v822_v53, %v821_v49  ;;  %v302_v56 = vpop.f32.mrb[11].mxu0  ;;  %v366_v57 = vpop.f32.mrb[11].mxu1 }
 0x12e   :  { %v683_v58 = vpack.c.bf16 %v302_v56, %v299_v50  ;;  %v723_v59 = vpack.c.bf16 %v366_v57, %v363_v51 }
 0x12f   :  { %744 = vst [vmem:[#allocation7 + $0x28] sm:$0xff] %v688_v54   ;;  %752 = vst [vmem:[#allocation7 + $0x68] sm:$0xff] %v728_v55  }
 0x130   :  { %743 = vst [vmem:[#allocation7 + $0x20] sm:$0xff] %v683_v58   ;;  %751 = vst [vmem:[#allocation7 + $0x60] sm:$0xff] %v723_v59  }
 0x132   :  { %v809_v60 = vpop.f32.mrb[12].mxu0  ;;  %v825_v61 = vpop.f32.mrb[12].mxu1 }
 0x133   :  { %v315_v62 = vpop.f32.mrb[13].mxu0  ;;  %v379_v63 = vpop.f32.mrb[13].mxu1 }
 0x134   :  { %v810_v0 = vpop.f32.mrb[14].mxu0  ;;  %v826_v1 = vpop.f32.mrb[14].mxu1 }
 0x135   :  { %v698_v2 = vpack.c.bf16 %v810_v0, %v809_v60  ;;  %v738_v3 = vpack.c.bf16 %v826_v1, %v825_v61  ;;  %v318_v4 = vpop.f32.mrb[15].mxu0  ;;  %v382_v5 = vpop.f32.mrb[15].mxu1 }
 0x136   :  { %v693_v6 = vpack.c.bf16 %v318_v4, %v315_v62  ;;  %v733_v7 = vpack.c.bf16 %v382_v5, %v379_v63 }
 0x137   :  { %746 = vst [vmem:[#allocation7 + $0x38] sm:$0xff] %v698_v2   ;;  %754 = vst [vmem:[#allocation7 + $0x78] sm:$0xff] %v738_v3  }
 0x138   :  { %745 = vst [vmem:[#allocation7 + $0x30] sm:$0xff] %v693_v6   ;;  %753 = vst [vmem:[#allocation7 + $0x70] sm:$0xff] %v733_v7  }
 0x139   :  { %927 = shalt.err (!%p924_p6)
}
 0x13a   :  { %s928_s10 = scalar_lea.hbm %s1011_s2, 2048 }
 0x13b   :  { %p929_p7 = scmp.ne.s32.totalorder %s1011_s2, %s928_s10  ;;  %p932_p8 = scmp.lt.u32.totalorder %s928_s10, %s1011_s2 }
 0x13d   :  { %p934_p9 = pnand %p932_p8, %p929_p7 }
 0x13f   :  { %937 = shalt.err (!%p934_p9)
}
 0x140   :  { %565 = dma.vmem_to_hbm [thread:$0]  %s560_s6, 2048, %s1011_s2, [#allocation4], %s945_s19, %s945_s19, %s946_s20  }
 0x141   :  { %942 = dma.done.wait [#allocation4], 2048  }
 0x142   :  { %943 = vsyncadd [#allocation4], 4294965248 }
 0x143   :  { %569 = vsyncpa [#allocation3], 1 }
 0x144   :  { %570 = vsyncpa [#allocation6], 1 }
 0x145   :  { %571 = vsyncpa [#allocation4], 1 }

</bundles_post_ra>
